<compile_context>
chip_gen: v7x
topology: tpu7x:2x2x1
jax: 0.10.0
libtpu: 0.0.40
codegen_flags: <defaults>
</compile_context>

<pallas_src>
import functools

import jax
import jax.numpy as jnp
from jax.experimental import pallas as pl
from jax.experimental.pallas import tpu as pltpu

_LANE = 128
_MAX_CIN_TILE = 512                            # K-tile cap (f32: 512*t_hw*4*2 per x buffer)
_VMEM_WORKING_SET_BUDGET = 24 * 1024 * 1024    # double-buffered tiles + scratch target
_VMEM_LIMIT_BYTES = 48 * 1024 * 1024           # safe on v5e/v6e (128 MiB) and v7x (64 MiB)
_SMEM_BIAS_MAX_COUT = 32                       # unrolled SMEM-scalar bias epilogue limit


def _round_down_lane(v):
    return (v // _LANE) * _LANE


def _choose_k_tile(c_in, max_tk):
    """C_in tile: full extent if small, else a 128-multiple divisor of C_in."""
    if c_in <= max_tk:
        return c_in
    for tk in range(_round_down_lane(max_tk), 0, -_LANE):
        if c_in % tk == 0:
            return tk
    return c_in  # no clean divisor: single K block (correctness first)


def _outconv_kernel(x_ref, w_ref, b_ref, o_ref, acc_ref, *, bias_in_smem):
    """One (image, HW-tile, C_in-tile) grid step of the 1x1 conv.

    x_ref  : (tk, t_hw)     VMEM  input channels x spatial (lane-dense)
    w_ref  : (C_out, tk)    VMEM  weight slice for this C_in tile
    b_ref  : (C_out,) SMEM  or (C_out, 1) VMEM  bias
    o_ref  : (C_out, t_hw)  VMEM  output tile (same block across the K axis)
    acc_ref: (C_out, t_hw)  f32 VMEM scratch accumulator
    """
    k = pl.program_id(2)

    @pl.when(k == 0)
    def _init():
        acc_ref[...] = jnp.zeros_like(acc_ref)

    acc_ref[...] += jnp.dot(w_ref[...], x_ref[...],
                            preferred_element_type=jnp.float32)

    @pl.when(k == pl.num_programs(2) - 1)
    def _finalize():
        acc = acc_ref[...]
        if bias_in_smem:
            # C_out is small for OutConv (= #classes): unrolled scalar bias
            # adds, one row store each; no extra VMEM operand in the pipeline.
            for co in range(o_ref.shape[0]):
                o_ref[co:co + 1, :] = (
                    acc[co:co + 1, :] + b_ref[co]).astype(o_ref.dtype)
        else:
            o_ref[...] = (acc + b_ref[...].astype(jnp.float32)).astype(o_ref.dtype)


def out_conv(x_nchw, weight, bias):
    """1x1 Conv2d forward (NCHW), equivalent to nn.Conv2d(C_in, C_out, 1).

    x_nchw: (N, C_in, H, W)
    weight: (C_out, C_in, 1, 1)   -- PyTorch Conv2d layout
    bias:   (C_out,)
    returns (N, C_out, H, W)
    """
    N, C_in, H, W = x_nchw.shape
    C_out = weight.shape[0]
    assert weight.shape == (C_out, C_in, 1, 1)
    assert bias.shape == (C_out,)
    HW = H * W

    # Pure reshapes (contiguous): channels stay ahead of the dense spatial
    # axis, so the kernel output is already NCHW.
    x = x_nchw.reshape(N, C_in, HW)
    w = weight.reshape(C_out, C_in).astype(x.dtype)  # keep bf16 in bf16; f32 accum in-dot

    # ---- C_in (reduction) tiling -------------------------------------------
    tk = _choose_k_tile(C_in, _MAX_CIN_TILE)
    num_k = C_in // tk

    # ---- H*W (lane) tiling, sized from a VMEM working-set budget -----------
    x_bytes = x.dtype.itemsize
    o_bytes = x.dtype.itemsize
    w_ws = C_out * tk * w.dtype.itemsize * 2               # double-buffered, tiny
    per_lane = tk * x_bytes * 2 + C_out * o_bytes * 2 + C_out * 4
    max_t_hw = max(_LANE, _round_down_lane(
        max(0, _VMEM_WORKING_SET_BUDGET - w_ws) // per_lane))

    t_hw = HW if HW <= max_t_hw else max_t_hw
    # Single-image calls: split HW so a dual-TensorCore chip (v7x) gets >=2
    # parallel blocks instead of a (1, 1) grid.
    if N == 1 and t_hw >= HW and HW > _LANE:
        t_hw = max(_LANE, _round_down_lane((HW + 1) // 2))

    grid = (N, pl.cdiv(HW, t_hw), num_k)

    # ---- bias placement ------------------------------------------------------
    bias_in_smem = C_out <= _SMEM_BIAS_MAX_COUT
    if bias_in_smem:
        b_arg = bias.astype(jnp.float32)
        b_spec = pl.BlockSpec(memory_space=pltpu.MemorySpace.SMEM)
    else:
        b_arg = bias.reshape(C_out, 1).astype(jnp.float32)
        b_spec = pl.BlockSpec((C_out, 1), lambda n, j, k: (0, 0))

    kernel = functools.partial(_outconv_kernel, bias_in_smem=bias_in_smem)

    out = pl.pallas_call(
        kernel,
        out_shape=jax.ShapeDtypeStruct((N, C_out, HW), x_nchw.dtype),
        grid=grid,
        in_specs=[
            pl.BlockSpec((None, tk, t_hw), lambda n, j, k: (n, k, j)),
            pl.BlockSpec((C_out, tk), lambda n, j, k: (0, k)),
            b_spec,
        ],
        out_specs=pl.BlockSpec((None, C_out, t_hw), lambda n, j, k: (n, 0, j)),
        scratch_shapes=[pltpu.VMEM((C_out, t_hw), jnp.float32)],
        compiler_params=pltpu.CompilerParams(
            dimension_semantics=("parallel", "parallel", "arbitrary"),
            vmem_limit_bytes=_VMEM_LIMIT_BYTES),
    )(x, w, b_arg)

    return out.reshape(N, C_out, H, W)


if __name__ == "__main__":
    key = jax.random.PRNGKey(0)
    k_x, k_w, k_b = jax.random.split(key, 3)

    N, C_in, C_out, H, W = 2, 4, 3, 16, 16

    x = jax.random.normal(k_x, (N, C_in, H, W), dtype=jnp.float32)
    # Deterministic synthetic parameters matching nn.Conv2d(in, out, 1) shapes.
    weight = jax.random.normal(k_w, (C_out, C_in, 1, 1), dtype=jnp.float32) * 0.1
    bias = jax.random.normal(k_b, (C_out,), dtype=jnp.float32) * 0.1

    y = jax.block_until_ready(out_conv(x, weight, bias))

    # Reference check (plain JAX).
    ref = (
        jnp.einsum("nchw,oc->nohw", x, weight.reshape(C_out, C_in))
        + bias.reshape(1, C_out, 1, 1)
    )
    assert y.shape == (N, C_out, H, W)
    assert jnp.allclose(y, ref, atol=1e-5, rtol=1e-5)

    print("KERNEL_OK")
</pallas_src>

<mosaic_0001>
module attributes {stable_mosaic.version = 11 : i64} {
  func.func @_outconv_kernel(%arg0: i32, %arg1: i32, %arg2: i32, %arg3: memref<1x4x256xf32, #tpu.memory_space<vmem>>, %arg4: memref<3x4xf32, #tpu.memory_space<vmem>>, %arg5: memref<3xf32, #tpu.memory_space<smem>>, %arg6: memref<1x3x256xf32, #tpu.memory_space<vmem>>, %arg7: memref<3x256xf32, #tpu.memory_space<vmem>>) attributes {dimension_semantics = [#tpu.dimension_semantics<parallel>, #tpu.dimension_semantics<parallel>, #tpu.dimension_semantics<arbitrary>], iteration_bounds = array<i64: 2, 1, 1>, scalar_prefetch = 0 : i64, scratch_operands = 1 : i64, tpu.core_type = #tpu.core_type<tc>, window_params = [{transform_indices = @transform_0, window_bounds = array<i64: 1, 4, 256>}, {transform_indices = @transform_1, window_bounds = array<i64: 3, 4>}, {transform_indices = @transform_2, window_bounds = array<i64: 3>}, {transform_indices = @transform_3, window_bounds = array<i64: 1, 3, 256>}]} {
    %c0_i32 = arith.constant 0 : i32
    %0 = arith.cmpi eq, %arg2, %c0_i32 : i32
    %1 = arith.extui %0 : i1 to i32
    %c0_i32_0 = arith.constant 0 : i32
    %2 = arith.cmpi ne, %1, %c0_i32_0 : i32
    scf.if %2 {
      %cst_11 = arith.constant 0.000000e+00 : f32
      %13 = vector.broadcast %cst_11 : f32 to vector<3x256xf32>
      %c0_12 = arith.constant 0 : index
      %c0_13 = arith.constant 0 : index
      %14 = vector.load %arg7[%c0_12, %c0_13] : memref<3x256xf32, #tpu.memory_space<vmem>>, vector<3x256xf32>
      tpu.vector_store %arg7[%c0_12, %c0_13], %13 {strides = array<i32>} : memref<3x256xf32, #tpu.memory_space<vmem>>, vector<3x256xf32>,
    } else {
    }
    %c0 = arith.constant 0 : index
    %c0_1 = arith.constant 0 : index
    %3 = vector.load %arg7[%c0, %c0_1] : memref<3x256xf32, #tpu.memory_space<vmem>>, vector<3x256xf32>
    %c0_2 = arith.constant 0 : index
    %c0_3 = arith.constant 0 : index
    %4 = vector.load %arg4[%c0_2, %c0_3] : memref<3x4xf32, #tpu.memory_space<vmem>>, vector<3x4xf32>
    %c0_4 = arith.constant 0 : index
    %c0_5 = arith.constant 0 : index
    %c0_6 = arith.constant 0 : index
    %5 = vector.load %arg3[%c0_4, %c0_5, %c0_6] : memref<1x4x256xf32, #tpu.memory_space<vmem>>, vector<1x4x256xf32>
    %6 = vector.shape_cast %5 : vector<1x4x256xf32> to vector<4x256xf32>
    %cst = arith.constant dense<0.000000e+00> : vector<3x256xf32>
    %7 = tpu.matmul %4, %6, %cst {dimension_numbers = #tpu.dot_dimension_numbers<[1], [0], [0], [1], [0, 0, 1, 1], [], []>} : vector<3x4xf32>, vector<4x256xf32>, vector<3x256xf32> -> vector<3x256xf32>
    %8 = arith.addf %3, %7 : vector<3x256xf32>
    %c0_7 = arith.constant 0 : index
    %c0_8 = arith.constant 0 : index
    %9 = vector.load %arg7[%c0_7, %c0_8] : memref<3x256xf32, #tpu.memory_space<vmem>>, vector<3x256xf32>
    tpu.vector_store %arg7[%c0_7, %c0_8], %8 {strides = array<i32>} : memref<3x256xf32, #tpu.memory_space<vmem>>, vector<3x256xf32>,
    %c0_i32_9 = arith.constant 0 : i32
    %10 = arith.cmpi eq, %arg2, %c0_i32_9 : i32
    %11 = arith.extui %10 : i1 to i32
    %c0_i32_10 = arith.constant 0 : i32
    %12 = arith.cmpi ne, %11, %c0_i32_10 : i32
    scf.if %12 {
      %c0_11 = arith.constant 0 : index
      %c0_12 = arith.constant 0 : index
      %13 = vector.load %arg7[%c0_11, %c0_12] : memref<3x256xf32, #tpu.memory_space<vmem>>, vector<3x256xf32>
      %14 = vector.extract_strided_slice %13 {offsets = [0, 0], sizes = [1, 256], strides = [1, 1]} : vector<3x256xf32> to vector<1x256xf32>
      %c0_13 = arith.constant 0 : index
      %15 = memref.load %arg5[%c0_13] : memref<3xf32, #tpu.memory_space<smem>>
      %16 = vector.broadcast %15 : f32 to vector<1x256xf32>
      %17 = arith.addf %14, %16 : vector<1x256xf32>
      %c0_14 = arith.constant 0 : index
      %c0_15 = arith.constant 0 : index
      %c0_16 = arith.constant 0 : index
      %18 = vector.load %arg6[%c0_14, %c0_15, %c0_16] : memref<1x3x256xf32, #tpu.memory_space<vmem>>, vector<1x1x256xf32>
      %19 = vector.shape_cast %18 : vector<1x1x256xf32> to vector<1x256xf32>
      %20 = vector.shape_cast %17 : vector<1x256xf32> to vector<1x1x256xf32>
      tpu.vector_store %arg6[%c0_14, %c0_15, %c0_16], %20 {strides = array<i32>} : memref<1x3x256xf32, #tpu.memory_space<vmem>>, vector<1x1x256xf32>,
      %21 = vector.extract_strided_slice %13 {offsets = [1, 0], sizes = [1, 256], strides = [1, 1]} : vector<3x256xf32> to vector<1x256xf32>
      %c1 = arith.constant 1 : index
      %22 = memref.load %arg5[%c1] : memref<3xf32, #tpu.memory_space<smem>>
      %23 = vector.broadcast %22 : f32 to vector<1x256xf32>
      %24 = arith.addf %21, %23 : vector<1x256xf32>
      %c0_17 = arith.constant 0 : index
      %c1_18 = arith.constant 1 : index
      %c0_19 = arith.constant 0 : index
      %25 = vector.load %arg6[%c0_17, %c1_18, %c0_19] : memref<1x3x256xf32, #tpu.memory_space<vmem>>, vector<1x1x256xf32>
      %26 = vector.shape_cast %25 : vector<1x1x256xf32> to vector<1x256xf32>
      %27 = vector.shape_cast %24 : vector<1x256xf32> to vector<1x1x256xf32>
      tpu.vector_store %arg6[%c0_17, %c1_18, %c0_19], %27 {strides = array<i32>} : memref<1x3x256xf32, #tpu.memory_space<vmem>>, vector<1x1x256xf32>,
      %28 = vector.extract_strided_slice %13 {offsets = [2, 0], sizes = [1, 256], strides = [1, 1]} : vector<3x256xf32> to vector<1x256xf32>
      %c2 = arith.constant 2 : index
      %29 = memref.load %arg5[%c2] : memref<3xf32, #tpu.memory_space<smem>>
      %30 = vector.broadcast %29 : f32 to vector<1x256xf32>
      %31 = arith.addf %28, %30 : vector<1x256xf32>
      %c0_20 = arith.constant 0 : index
      %c2_21 = arith.constant 2 : index
      %c0_22 = arith.constant 0 : index
      %32 = vector.load %arg6[%c0_20, %c2_21, %c0_22] : memref<1x3x256xf32, #tpu.memory_space<vmem>>, vector<1x1x256xf32>
      %33 = vector.shape_cast %32 : vector<1x1x256xf32> to vector<1x256xf32>
      %34 = vector.shape_cast %31 : vector<1x256xf32> to vector<1x1x256xf32>
      tpu.vector_store %arg6[%c0_20, %c2_21, %c0_22], %34 {strides = array<i32>} : memref<1x3x256xf32, #tpu.memory_space<vmem>>, vector<1x1x256xf32>,
    } else {
    }
    return
  }
  func.func @transform_0(%arg0: i32, %arg1: i32, %arg2: i32) -> (i32, i32, i32) {
    %c0_i32 = arith.constant 0 : i32
    return %arg0, %arg2, %arg1 : i32, i32, i32
  }
  func.func @transform_1(%arg0: i32, %arg1: i32, %arg2: i32) -> (i32, i32) {
    %c0_i32 = arith.constant 0 : i32
    %c0_i32_0 = arith.constant 0 : i32
    return %c0_i32, %arg2 : i32, i32
  }
  func.func @transform_2(%arg0: i32, %arg1: i32, %arg2: i32) -> i32 {
    %c0_i32 = arith.constant 0 : i32
    %c0_i32_0 = arith.constant 0 : i32
    return %c0_i32 : i32
  }
  func.func @transform_3(%arg0: i32, %arg1: i32, %arg2: i32) -> (i32, i32, i32) {
    %c0_i32 = arith.constant 0 : i32
    %c0_i32_0 = arith.constant 0 : i32
    return %arg0, %c0_i32, %arg1 : i32, i32, i32
  }
}

</mosaic_0001>

<bundles_post_ra>
// kernel: tpu_custom_call.1
= control target key start
LH: loop header
LB: loop body
LE: loop exit
PB: predicated region body
PF: predicated region fallthrough
CT: control target
= control target key end

     0   :  { %8 = vsyncpa [#allocation4], 0  ;;  %s999_s0 = inlined_call_operand.hbm [shape: f32[2,4,256], index: 0, kind: input, shape index: {}]   ;;  %s1000_s1 = inlined_call_operand.hbm [shape: f32[3,4], index: 1, kind: input, shape index: {}]   ;;  %s1001_s2 = inlined_call_operand.vmem [shape: f32[3], index: 2, kind: input, shape index: {}]   ;;  %s1002_s3 = inlined_call_operand.vmem [shape: f32[2,3,256], index: 3, kind: output, shape index: {}]  }
   0x1   :  { %10 = vsyncpa [#allocation4 + $0x1], 0 }
   0x2   :  { %11 = vsyncpa [#allocation7], 0 }
   0x3   :  { %12 = vsyncpa [#allocation5], 0  ;;  %s817_s12 = smov 0   ;;  %s819_s13 = smov 0  }
   0x4   :  { %s821_s14 = smov 0   ;;  %s823_s15 = smov 0  }
   0x5   :  { %s825_s16 = smov 0   ;;  %s827_s17 = smov 0  }
   0x6 LB: > { %s554_s18 = sadd.s32 4294967295, %s790_s17   ;;  %p61_p0 = scmp.ne.s32.totalorder %s774_s13, %s770_s12  ;;  %s790_s17 = sphi %s827_s17, %s18_s17   ;;  %s786_s16 = sphi %s825_s16, %s1019_s16   ;;  %s782_s15 = sphi %s823_s15, %s1018_s15   ;;  %s778_s14 = sphi %s821_s14, %s1017_s14   ;;  %s774_s13 = sphi %s819_s13, %s1016_s13   ;;  %s770_s12 = sphi %s817_s12, %s1015_s12  }
   0x7   : > { %p847_p1 = scmp.eq.s32.totalorder %s554_s18, 0  ;;  %p556_p2 = scmp.ge.s32.totalorder %s790_s17, 1 }
   0x8   : > { %p147_p3 = scmp.lt.s32.totalorder %s790_s17, 3  ;;  %s792_s22 = smov [#allocation6]  }
   0x9   : > { %s1007_s19 = scalar_select %p847_p1, 1, 0 }
   0xa   : > { %p855_p4 = por %p847_p1, %p61_p0  ;;  %p859_p5 = pnand %p556_p2, %p147_p3 }
   0xb   : > { %s162_s23 = sshll.u32 %s792_s22, 4  ;;  %s173_s26 = sshll.u32 %s1001_s2, 4  ;;  %s163_s23 = int_to_ptr.vmem [resolvable:$true] %s162_s23  ;;  %s868_s26 = int_to_ptr.vmem [resolvable:$true] %s173_s26 }
   0xc   : > { %s1008_s20 = scalar_select %p855_p4, 1, 0 }
   0xd   : > { %s1009_s21 = scalar_select %p859_p5, 1, 0 }
   0xe   : > { %p590_p6 = pneg %p859_p5  ;;  %s659_s30 = scalar_lea.hbm %s1000_s1, 64 }
   0xf   : > { %p660_p8 = scmp.ne.s32.totalorder %s1000_s1, %s659_s30  ;;  %p666_p12 = scmp.lt.u32.totalorder %s659_s30, %s1000_s1 }
  0x10   : > { %p872_p7 = pnand %p590_p6, %p847_p1 }
  0x12   : > { %p661_p9 = pneg %p872_p7 }
  0x14   : > { %p662_p10 = pnand %p661_p9, %p660_p8 }
  0x16   : > { %p663_p11 = pneg %p662_p10 }
  0x18   : > { %p668_p13 = pnand %p666_p12, %p663_p11 }
  0x1a   : > { %671 = shalt.err (!%p668_p13)
}
  0x1b   : > { %s672_s8 = scalar_lea.vmem %s163_s23, 64  ;;  %p680_p6 = scmp.lt.s32.totalorder %s163_s23, %s163_s23 }
  0x1c   : > { %p673_p0 = scmp.ne.s32.totalorder %s163_s23, %s672_s8  ;;  %p681_p1 = scmp.lt.s32.totalorder %s672_s8, %s672_s8 }
  0x1e   : > { %p675_p2 = pnand %p673_p0, %p661_p9  ;;  %p682_p4 = por %p681_p1, %p680_p6 }
  0x20   : > { %p676_p3 = pneg %p675_p2 }
  0x22   : > { %p683_p5 = pnand %p682_p4, %p676_p3 }
  0x24   : > { %686 = shalt.err (!%p683_p5)
}
  0x25   : > { %593 = dma.hbm_to_vmem [thread:$0]  (!%p872_p7), %s1000_s1, 64, %s163_s23, [#allocation7]  }
  0x26   : > { %s687_s11 = scalar_lea.vmem %s868_s26, 16  ;;  %p695_p1 = scmp.lt.s32.totalorder %s868_s26, %s868_s26 }
  0x27   : > { %p688_p8 = scmp.ne.s32.totalorder %s868_s26, %s687_s11  ;;  %p696_p4 = scmp.lt.s32.totalorder %s687_s11, %s687_s11 }
  0x29   : > { %p690_p10 = pnand %p688_p8, %p661_p9  ;;  %p697_p5 = por %p696_p4, %p695_p1 }
  0x2b   : > { %p691_p11 = pneg %p690_p10 }
  0x2d   : > { %p698_p12 = pnand %p697_p5, %p691_p11 }
  0x2f   : > { %701 = shalt.err (!%p698_p12)
}
  0x30   : > { %s793_s12 = smov [#allocation8]   ;;  %s37_s18 = sadd.s32 1, %s786_s16 }
  0x31   : > { %596 = dma.vmem_to_smem (!%p872_p7), %s868_s26, 16, %s793_s12, [#allocation5]  }
  0x32   : > { %s48_s22 = sadd.s32 1, %s778_s14  ;;  %p39_p9 = scmp.ge.s32.totalorder %s37_s18, 2 }
  0x33   : > { %p55_p13 = scmp.ne.s32.totalorder %s778_s14, %s774_s13  ;;  %p56_p0 = scmp.eq.s32.totalorder %s790_s17, 0 }
  0x34   : > { %p603_p2 = scmp.lt.s32.totalorder %s790_s17, 2  ;;  %s1021_s18 = smov (%p39_p9, %s37_s18), 0 }
  0x35   : > { %p57_p3 = por %p56_p0, %p55_p13  ;;  %s184_s23 = sand.u32 1, %s778_s14  }
  0x36   : > { %s41_s24 = ssub.s32 %s786_s16, %s1021_s18  ;;  %s560_s25 = sshll.u32 %s184_s23, 3 }
  0x37   : > { %p46_p6 = scmp.eq.s32.totalorder %s41_s24, 0  ;;  %s578_s27 = sshll.u32 %s786_s16, 7 }
  0x38   : > { %s926_s30 = scalar_lea.hbm %s999_s0, %s578_s27  ;;  %s188_s4 = scalar_lea.vmem [#allocation3], %s560_s25 }
  0x39   : > { %s921_s28 = scalar_select %p46_p6, %s778_s14, %s48_s22  }
  0x3a   : > { %s200_s5 = sshll.u32 %s188_s4, 4  ;;  %p932_p7 = pnand %p603_p2, %p57_p3  ;;  %s928_s5 = int_to_ptr.vmem [resolvable:$true] %s200_s5 }
  0x3b   : > { %s185_s7 = scalar_lea.sflag [#allocation4], %s184_s23  ;;  %s702_s8 = scalar_lea.hbm %s926_s30, 128 }
  0x3c   : > { %p703_p8 = scmp.ne.s32.totalorder %s926_s30, %s702_s8  ;;  %p704_p10 = pneg %p932_p7 }
  0x3d   : > { %s707_s11 = scalar_lea.hbm %s999_s0, 256  ;;  %p708_p4 = scmp.lt.u32.totalorder %s926_s30, %s999_s0 }
  0x3e   : > { %p705_p11 = pnand %p704_p10, %p703_p8  ;;  %p709_p5 = scmp.lt.u32.totalorder %s707_s11, %s702_s8 }
  0x3f   : > { %p711_p9 = scmp.lt.u32.totalorder %s702_s8, %s926_s30 }
  0x40   : > { %p706_p1 = pneg %p705_p11  ;;  %p710_p12 = por %p709_p5, %p708_p4 }
  0x42   : > { %p712_p13 = por %p711_p9, %p710_p12 }
  0x44   : > { %p713_p0 = pnand %p712_p13, %p706_p1 }
  0x46   : > { %716 = shalt.err (!%p713_p0)
}
  0x47   : > { %s717_s23 = scalar_lea.vmem %s928_s5, 128  ;;  %s794_s24 = smov [#allocation3]  }
  0x48   : > { %p718_p2 = scmp.ne.s32.totalorder %s928_s5, %s717_s23  ;;  %s722_s25 = sshll.u32 %s794_s24, 4  ;;  %s723_s25 = int_to_ptr.vmem [resolvable:$false] %s722_s25 }
  0x49   : > { %s724_s27 = scalar_lea.vmem %s723_s25, 256  ;;  %p725_p8 = scmp.lt.s32.totalorder %s928_s5, %s723_s25 }
  0x4a   : > { %p720_p3 = pnand %p718_p2, %p704_p10  ;;  %p726_p11 = scmp.lt.s32.totalorder %s724_s27, %s717_s23 }
  0x4c   : > { %p721_p6 = pneg %p720_p3  ;;  %p727_p4 = por %p726_p11, %p725_p8 }
  0x4e   : > { %p728_p5 = pnand %p727_p4, %p721_p6 }
  0x50   : > { %731 = shalt.err (!%p728_p5)
}
  0x51   : > { %600 = dma.hbm_to_vmem [thread:$0]  (!%p932_p7), %s926_s30, 128, %s928_s5, %s185_s7  }
  0x52   : > { %p1012_p1 = scmp.ne.s32.totalorder %s1009_s21, 0 }
  0x53   : > { %s211_s29 = sand.u32 (!%p1012_p1), 1, %s774_s13   ;;  %p1013_p10 = scmp.ne.s32.totalorder (!%p1012_p1), %s1008_s20, 0 }
  0x54   : > { %209 = sbr.rel (%p1012_p1) target bundleno = 338 (0x152), region = 32  ;;  %s564_s26 = sshll.u32 (!%p1012_p1), %s211_s29, 3 }
  0x55   : > { %s212_s4 = scalar_lea.sflag (!%p1012_p1), [#allocation4], %s211_s29  ;;  %s215_s8 = scalar_lea.vmem (!%p1012_p1), [#allocation3], %s564_s26 }
  0x5b   : > { %757 = dma.done.wait (%p1013_p10), %s212_s4, 128  }
  0x5c   : > { %759 = vsyncadd (%p1013_p10), %s212_s4, 4294967168  ;;  %p1014_p12 = scmp.ne.s32.totalorder %s1007_s19, 0 }
  0x5e   : > { %761 = dma.done.wait (%p1014_p12), [#allocation7], 64  }
  0x5f   : > { %763 = vsyncadd (%p1014_p12), [#allocation7], 4294967232 }
  0x60   : > { %765 = dma.done.wait (%p1014_p12), [#allocation5], 16  }
  0x61   : > { %767 = vsyncadd (%p1014_p12), [#allocation5], 4294967280 }
  0x62   : > { %228 = sfence }
  0x63   : > { %v269_v0 = vld [vmem:[%s215_s8] sm:$0xff]  ;;  %vm276_vm0 = vcmask 1043456   ;;  %v795_v2 = vmov 0.0   ;;  %v268_v3 = vld [vmem:[#allocation6] sm:$0x7]  ;;  %vm272_vm1 = vcmask 31744   ;;  %v369_v11 = vlaneseq }
  0x64   : > { %v271_v1 = vcombine.high %v269_v0, %v269_v0  ;;  %266 = vst [vmem:[#allocation2] sm:$0x77] %v795_v2  ;;  %345 = vmatprep.mubr.f32.mxu0 %v795_v2  ;;  %s362_s19 = sld [smem:[#allocation8]]  ;;  %s572_s20 = sld [smem:[#allocation8 + $0x1]]  ;;  %v796_v9 = vmov 1966171168  }
  0x65   : > { %s574_s21 = sld [smem:[#allocation8 + $0x2]]  ;;  %v367_v10 = vunpack.c.l.s4 %v796_v9  ;;  %p253_p7 = scmp.lt.s32.totalorder %s782_s15, 1  ;;  %v370_v13 = vshrl.u32 %v369_v11, 7  ;;  %vm383_vm2 = vcmp.lt.s32.totalorder %v369_v11, 256 }
  0x66   : > { %569 = vmatprep.subr.msk.mxu0 %vm276_vm0, %v271_v1 }
  0x67   : > { %570 = vmatpush1.msk.msra.mxu0 %vm276_vm0, %v269_v0  ;;  %v368_v12 = vunpack.c.0.s8 %v367_v10  ;;  %s1023_s15 = smov (!%p253_p7, %s782_s15), 1 }
  0x68   : > { %571 = vmatmul.mubr.msk.f32.vlgmr.msra.gmra.mrb[0].mxu0 %vm272_vm1, %v268_v3  ;;  %s579_s30 = sshll.u32 %s1023_s15, 3 }
  0x69   : > { %v371_v17 = vsub.s32 %v368_v12, %v370_v13  ;;  %s260_s7 = scalar_lea.vmem %s1002_s3, %s579_s30 }
  0x6a   : > { %v363_v14 = vstv %s362_s19  ;;  %v387_v15 = vstv %s572_s20 }
  0x6b   : > { %v267_v5 = vld [vmem:[#allocation2] sm:$0x77]  ;;  %v409_v16 = vstv %s574_s21 }
 0x13b   : > { %v347_v4 = vpop.f32.mrb[0].mxu0 }
 0x13c   : > { %v349_v6 = vpop.f32.mrb[1].mxu0 }
 0x13d   : > { %v354_v7 = vcombine.low %v347_v4, %v349_v6 }
 0x13f   : > { %v356_v8 = vadd.f32 %v354_v7, %v267_v5 }
 0x141   : > { %357 = vst [vmem:[#allocation2] sm:$0x77] %v356_v8 }
 0x148   : > { %v361_v18 = vld [vmem:[#allocation2] sm:$0x77] }
 0x149   : > { %v364_v19 = vadd.f32 %v363_v14, %v361_v18  ;;  %v388_v20 = vadd.f32 %v387_v15, %v361_v18  ;;  %v410_v21 = vadd.f32 %v409_v16, %v361_v18 }
 0x14b   : > { %v372_v22 = vrot.slane %v364_v19, %v371_v17  ;;  %v396_v23 = vrot.slane %v388_v20, %v371_v17  ;;  %v418_v24 = vrot.slane %v410_v21, %v371_v17 }
 0x14d   : > { %v379_v25 = vrot.slane %v372_v22, %v371_v17  ;;  %v397_v26 = vcombine.high %v396_v23, %v396_v23  ;;  %v425_v27 = vrot.slane %v418_v24, %v371_v17 }
 0x14f   : > { %385 = vst.msk [vmem:[%s260_s7] ss:$4 sm:$0x3] %vm383_vm2, %v379_v25  ;;  %v404_v28 = vrot.slane %v397_v26, %v371_v17  ;;  %v426_v29 = vcombine.high %v425_v27, %v425_v27 }
 0x151   : > { %573 = vst.msk [vmem:[%s260_s7 + $0x1] ss:$4 sm:$0x3] %vm383_vm2, %v404_v28  ;;  %575 = vst.msk [vmem:[%s260_s7 + $0x2] ss:$4 sm:$0x3] %vm383_vm2, %v426_v29 }
 0x152 PF: > { %s18_s17 = sadd.s32 1, %s790_s17   ;;  %s1015_s12 = smov %s774_s13 }
 0x153   : > { %p15_p9 = scmp.ge.s32.totalorder %s18_s17, 4   ;;  %s1016_s13 = smov %s778_s14 }
 0x154   : > { %s1017_s14 = smov %s921_s28  ;;  %s1018_s15 = smov %s786_s16 }
 0x155   : > { %s1019_s16 = smov %s1021_s18  ;;  %17 = sbr.rel (!%p15_p9) target bundleno = 6 (0x6), region = 92 }
 0x15c   :  { %460 = vsyncpa [#allocation4], 1 }
 0x15d   :  { %462 = vsyncpa [#allocation4 + $0x1], 1 }
 0x15e   :  { %463 = vsyncpa [#allocation7], 1 }
 0x15f   :  { %464 = vsyncpa [#allocation5], 1 }
 0x160   :  { %466 = vsyncpa [#allocation5 + $0x1], 1 }

</bundles_post_ra>
